<compile_context>
chip_gen: v7x
topology: tpu7x:2x2x1
jax: 0.10.0
libtpu: 0.0.40
codegen_flags: <defaults>
</compile_context>

<pallas_src>
import functools

import jax
import jax.numpy as jnp
from jax import lax
from jax.experimental import pallas as pl
from jax.experimental.pallas import tpu as pltpu

_LANES = 128
_SUBLANES = 8


def _round_up(x, m):
    return ((x + m - 1) // m) * m


def _sublane_multiple(*dtypes):
    # Native sublane packing: f32 -> 8, bf16/f16 -> 16, int8/fp8 -> 32.
    mult = _SUBLANES
    for dt in dtypes:
        itemsize = max(jnp.dtype(dt).itemsize, 1)
        mult = max(mult, (4 // itemsize) * _SUBLANES)
    return mult


def _default_num_core_splits():
    # Only v7x has 2 TensorCores per chip worth sharding across; on single-TC
    # v5e/v6e a split is just a serial loop plus extra padding/accumulators.
    try:
        kind = jax.devices()[0].device_kind.lower()
    except Exception:
        return 1
    return 2 if ("v7" in kind or "7x" in kind) else 1


def _focal_loss_kernel(x_ref, t_ref, acc_ref, *, gamma, has_partial_block,
                       n_blocks, tiles_per_core, tile_rows, total_rows):
    c = pl.program_id(0)
    i = pl.program_id(1)

    @pl.when(i == 0)
    def _():
        acc_ref[...] = jnp.zeros_like(acc_ref)

    x = x_ref[...].astype(jnp.float32)
    t = t_ref[...].astype(jnp.float32)

    # Numerically-stable binary_cross_entropy_with_logits (pos_weight=None):
    #   bce = max(x, 0) - x*t + log1p(exp(-|x|))
    bce = jnp.maximum(x, 0.0) - x * t + jnp.log1p(jnp.exp(-jnp.abs(x)))
    pt = jnp.exp(-bce)
    one_m_pt = 1.0 - pt

    g_int = int(gamma)
    if float(g_int) == float(gamma) and 0 <= g_int <= 8:
        # Integer-gamma fast path: repeated VPU multiplies instead of
        # jnp.power (log+exp on the single EUP slot).  Start from (1-pt)
        # directly so gamma=2 costs exactly one extra multiply per element.
        if g_int == 0:
            focal = bce
        else:
            mod = one_m_pt
            for _ in range(g_int - 1):
                mod = mod * one_m_pt
            focal = mod * bce
    else:
        focal = jnp.power(one_m_pt, jnp.float32(gamma)) * bce

    # alpha and the 1/N (mean) scaling are applied once to the final scalar in
    # the wrapper, not per element.

    def _accumulate(v):
        # Vreg-shaped accumulation: fold (tile_rows, 128) onto (8, 128) with
        # pure VPU adds; the single cross-lane reduce happens in the wrapper.
        acc_ref[...] += v.reshape(-1, _SUBLANES, _LANES).sum(axis=0)

    if has_partial_block:
        # Only the one block that straddles the valid-row boundary pays for
        # the iota/compare/select; every other block accumulates directly.
        block_idx = c * tiles_per_core + i

        @pl.when(block_idx != n_blocks - 1)
        def _():
            _accumulate(focal)

        @pl.when(block_idx == n_blocks - 1)
        def _():
            row0 = block_idx * tile_rows
            row_ids = row0 + lax.broadcasted_iota(jnp.int32, focal.shape, 0)
            _accumulate(jnp.where(row_ids < total_rows, focal, 0.0))
    else:
        _accumulate(focal)


def focal_loss(logits, targets, *, gamma=2.0, alpha=None, reduction="mean",
               pos_weight=None, max_tile_rows=4096, num_core_splits=None):
    """Pallas TPU implementation of FocalLoss.forward.

    Matches the PyTorch module for reduction in {'mean', 'sum'} and
    pos_weight=None.
    """
    # TODO(synk): pos_weight weighting and reduction='none' (elementwise
    #             output) are not implemented; module defaults are covered.
    assert pos_weight is None, "pos_weight not supported in this kernel"
    assert reduction in ("mean", "sum")
    assert logits.shape == targets.shape

    if num_core_splits is None:
        num_core_splits = _default_num_core_splits()

    n = 1
    for d in logits.shape:
        n *= int(d)

    sub_mult = _sublane_multiple(logits.dtype, targets.dtype)
    pad_unit = sub_mult * _LANES
    padded_n = _round_up(max(n, 1), pad_unit)

    x = logits.reshape(-1)
    t = targets.reshape(-1)
    if padded_n != n:
        # Rare path (element count not lane/sublane aligned).  Pad logits with
        # a large finite negative (NOT -inf: -inf * 0 target => NaN) and
        # targets with 0 so every padded element contributes exactly 0 to the
        # sum -- no in-kernel element mask is needed.
        x = jnp.pad(x, (0, padded_n - n), constant_values=-1e4)
        t = jnp.pad(t, (0, padded_n - n), constant_values=0)
    rows = padded_n // _LANES
    x = x.reshape(rows, _LANES)
    t = t.reshape(rows, _LANES)

    max_tile_rows = max(_round_up(max_tile_rows, sub_mult), sub_mult)
    tile_rows = min(max_tile_rows, rows)
    n_blocks = pl.cdiv(rows, tile_rows)
    has_partial_block = (rows % tile_rows) != 0

    # Shard across TensorCores only when the block count divides evenly, so no
    # grid step ever addresses a fully out-of-bounds block.
    if num_core_splits > 1 and n_blocks % num_core_splits != 0:
        num_core_splits = 1
    tiles_per_core = n_blocks // num_core_splits

    kernel = functools.partial(
        _focal_loss_kernel,
        gamma=float(gamma),
        has_partial_block=has_partial_block,
        n_blocks=n_blocks,
        tiles_per_core=tiles_per_core,
        tile_rows=tile_rows,
        total_rows=rows,
    )

    # Plain "parallel" barely changes codegen; CORE_PARALLEL is what actually
    # shards the leading axis across both TensorCores on v7x.
    core_sem = pltpu.CORE_PARALLEL if num_core_splits > 1 else pltpu.ARBITRARY

    partials = pl.pallas_call(
        kernel,
        out_shape=jax.ShapeDtypeStruct(
            (num_core_splits * _SUBLANES, _LANES), jnp.float32),
        grid_spec=pltpu.PrefetchScalarGridSpec(
            num_scalar_prefetch=0,
            grid=(num_core_splits, tiles_per_core),
            in_specs=[
                pl.BlockSpec((tile_rows, _LANES),
                             lambda c, i: (c * tiles_per_core + i, 0)),
                pl.BlockSpec((tile_rows, _LANES),
                             lambda c, i: (c * tiles_per_core + i, 0)),
            ],
            # Each core owns one (8,128) accumulator block, resident across
            # the reduction axis.
            out_specs=pl.BlockSpec((_SUBLANES, _LANES), lambda c, i: (c, 0)),
        ),
        compiler_params=pltpu.CompilerParams(
            dimension_semantics=(core_sem, pltpu.ARBITRARY),
            vmem_limit_bytes=32 * 1024 * 1024,
        ),
    )(x, t)

    total = jnp.sum(partials, dtype=jnp.float32)
    if alpha is not None:
        total = jnp.float32(alpha) * total
    if reduction == "mean":
        total = total / jnp.float32(n)
    return total


def _focal_loss_ref(logits, targets, gamma=2.0, alpha=None, reduction="mean"):
    x = logits.astype(jnp.float32)
    t = targets.astype(jnp.float32)
    bce = jnp.maximum(x, 0.0) - x * t + jnp.log1p(jnp.exp(-jnp.abs(x)))
    pt = jnp.exp(-bce)
    focal = (1.0 - pt) ** gamma * bce
    if alpha is not None:
        focal = alpha * focal
    if reduction == "mean":
        return focal.mean()
    return focal.sum()


if __name__ == "__main__":
    key = jax.random.PRNGKey(0)
    k1, k2, k3, k4, k5, k6 = jax.random.split(key, 6)

    # Test 1: multi-label classification shape (batch=16, num_labels=128), f32,
    # defaults (gamma=2, alpha=None, mean) -- aligned, no padding, no mask.
    B, L = 16, 128
    logits = jax.random.normal(k1, (B, L), dtype=jnp.float32) * 2.0
    targets = (jax.random.uniform(k2, (B, L)) > 0.5).astype(jnp.float32)

    loss = focal_loss(logits, targets, gamma=2, alpha=None, reduction="mean")
    loss = jax.block_until_ready(loss)
    ref = _focal_loss_ref(logits, targets, gamma=2.0, alpha=None, reduction="mean")
    assert jnp.allclose(loss, ref, rtol=1e-5, atol=1e-6), (loss, ref)

    # Test 2: ragged shape (exercises the -1e4 zero-contribution pad path),
    # alpha + sum reduction.
    B2, L2 = 5, 37
    logits2 = jax.random.normal(k3, (B2, L2), dtype=jnp.float32) * 3.0
    targets2 = (jax.random.uniform(k4, (B2, L2)) > 0.5).astype(jnp.float32)

    loss2 = focal_loss(logits2, targets2, gamma=2, alpha=0.25, reduction="sum")
    loss2 = jax.block_until_ready(loss2)
    ref2 = _focal_loss_ref(logits2, targets2, gamma=2.0, alpha=0.25, reduction="sum")
    assert jnp.allclose(loss2, ref2, rtol=1e-5, atol=1e-6), (loss2, ref2)

    # Test 3: bf16 inputs at the boundary (halved HBM traffic), upcast in-kernel.
    logits3 = logits.astype(jnp.bfloat16)
    targets3 = targets.astype(jnp.bfloat16)
    loss3 = focal_loss(logits3, targets3, gamma=2, alpha=None, reduction="mean")
    loss3 = jax.block_until_ready(loss3)
    ref3 = _focal_loss_ref(logits3, targets3, gamma=2.0, alpha=None, reduction="mean")
    assert jnp.allclose(loss3, ref3, rtol=1e-5, atol=1e-6), (loss3, ref3)

    # Test 4: rows not divisible by tile_rows -> exercises the pl.when-gated
    # partial-last-block row mask (no host-side padding at all).
    B4, L4 = 24, 128
    logits4 = jax.random.normal(k5, (B4, L4), dtype=jnp.float32) * 2.0
    targets4 = (jax.random.uniform(k6, (B4, L4)) > 0.5).astype(jnp.float32)
    loss4 = focal_loss(logits4, targets4, gamma=2, alpha=None, reduction="mean",
                       max_tile_rows=16)
    loss4 = jax.block_until_ready(loss4)
    ref4 = _focal_loss_ref(logits4, targets4, gamma=2.0, alpha=None, reduction="mean")
    assert jnp.allclose(loss4, ref4, rtol=1e-5, atol=1e-6), (loss4, ref4)

    print("KERNEL_OK")
</pallas_src>

<mosaic_0001>
module attributes {stable_mosaic.version = 11 : i64} {
  func.func @_focal_loss_kernel(%arg0: i32, %arg1: i32, %arg2: memref<16x128xf32, #tpu.memory_space<vmem>>, %arg3: memref<16x128xf32, #tpu.memory_space<vmem>>, %arg4: memref<8x128xf32, #tpu.memory_space<vmem>>) attributes {dimension_semantics = [#tpu.dimension_semantics<arbitrary>, #tpu.dimension_semantics<arbitrary>], iteration_bounds = array<i64: 1, 1>, scalar_prefetch = 0 : i64, scratch_operands = 0 : i64, tpu.core_type = #tpu.core_type<tc>, window_params = [{transform_indices = @transform_0, window_bounds = array<i64: 16, 128>}, {transform_indices = @transform_1, window_bounds = array<i64: 16, 128>}, {transform_indices = @transform_2, window_bounds = array<i64: 8, 128>}]} {
    %c0_i32 = arith.constant 0 : i32
    %0 = arith.cmpi eq, %arg1, %c0_i32 : i32
    %1 = arith.extui %0 : i1 to i32
    %c0_i32_0 = arith.constant 0 : i32
    %2 = arith.cmpi ne, %1, %c0_i32_0 : i32
    scf.if %2 {
      %cst_12 = arith.constant 0.000000e+00 : f32
      %27 = vector.broadcast %cst_12 : f32 to vector<8x128xf32>
      %c0_13 = arith.constant 0 : index
      %c0_14 = arith.constant 0 : index
      %28 = vector.load %arg4[%c0_13, %c0_14] : memref<8x128xf32, #tpu.memory_space<vmem>>, vector<8x128xf32>
      tpu.vector_store %arg4[%c0_13, %c0_14], %27 {strides = array<i32>} : memref<8x128xf32, #tpu.memory_space<vmem>>, vector<8x128xf32>,
    } else {
    }
    %c0 = arith.constant 0 : index
    %c0_1 = arith.constant 0 : index
    %3 = vector.load %arg2[%c0, %c0_1] : memref<16x128xf32, #tpu.memory_space<vmem>>, vector<16x128xf32>
    %c0_2 = arith.constant 0 : index
    %c0_3 = arith.constant 0 : index
    %4 = vector.load %arg3[%c0_2, %c0_3] : memref<16x128xf32, #tpu.memory_space<vmem>>, vector<16x128xf32>
    %cst = arith.constant 0.000000e+00 : f32
    %5 = vector.broadcast %cst : f32 to vector<16x128xf32>
    %6 = arith.maximumf %3, %5 : vector<16x128xf32>
    %7 = arith.mulf %3, %4 : vector<16x128xf32>
    %8 = arith.subf %6, %7 : vector<16x128xf32>
    %9 = math.absf %3 : vector<16x128xf32>
    %cst_4 = arith.constant 0.000000e+00 : f32
    %10 = vector.broadcast %cst_4 : f32 to vector<16x128xf32>
    %11 = arith.subf %10, %9 : vector<16x128xf32>
    %12 = math.exp %11 : vector<16x128xf32>
    %13 = math.log1p %12 : vector<16x128xf32>
    %14 = arith.addf %8, %13 : vector<16x128xf32>
    %cst_5 = arith.constant 0.000000e+00 : f32
    %15 = vector.broadcast %cst_5 : f32 to vector<16x128xf32>
    %16 = arith.subf %15, %14 : vector<16x128xf32>
    %17 = math.exp %16 : vector<16x128xf32>
    %cst_6 = arith.constant 1.000000e+00 : f32
    %18 = vector.broadcast %cst_6 : f32 to vector<16x128xf32>
    %19 = arith.subf %18, %17 : vector<16x128xf32>
    %20 = arith.mulf %19, %19 : vector<16x128xf32>
    %21 = arith.mulf %20, %14 : vector<16x128xf32>
    %c0_7 = arith.constant 0 : index
    %c0_8 = arith.constant 0 : index
    %22 = vector.load %arg4[%c0_7, %c0_8] : memref<8x128xf32, #tpu.memory_space<vmem>>, vector<8x128xf32>
    %23 = vector.shape_cast %21 : vector<16x128xf32> to vector<2x8x128xf32>
    %cst_9 = arith.constant dense<0.000000e+00> : vector<8x128xf32>
    %24 = vector.multi_reduction <add>, %23, %cst_9 [0] : vector<2x8x128xf32> to vector<8x128xf32>
    %25 = arith.addf %22, %24 : vector<8x128xf32>
    %c0_10 = arith.constant 0 : index
    %c0_11 = arith.constant 0 : index
    %26 = vector.load %arg4[%c0_10, %c0_11] : memref<8x128xf32, #tpu.memory_space<vmem>>, vector<8x128xf32>
    tpu.vector_store %arg4[%c0_10, %c0_11], %25 {strides = array<i32>} : memref<8x128xf32, #tpu.memory_space<vmem>>, vector<8x128xf32>,
    return
  }
  func.func @transform_0(%arg0: i32, %arg1: i32) -> (i32, i32) {
    %c1_i32 = arith.constant 1 : i32
    %0 = arith.muli %arg0, %c1_i32 : i32
    %1 = arith.addi %0, %arg1 : i32
    %c0_i32 = arith.constant 0 : i32
    %c0_i32_0 = arith.constant 0 : i32
    return %1, %c0_i32 : i32, i32
  }
  func.func @transform_1(%arg0: i32, %arg1: i32) -> (i32, i32) {
    %c1_i32 = arith.constant 1 : i32
    %0 = arith.muli %arg0, %c1_i32 : i32
    %1 = arith.addi %0, %arg1 : i32
    %c0_i32 = arith.constant 0 : i32
    %c0_i32_0 = arith.constant 0 : i32
    return %1, %c0_i32 : i32, i32
  }
  func.func @transform_2(%arg0: i32, %arg1: i32) -> (i32, i32) {
    %c0_i32 = arith.constant 0 : i32
    %c0_i32_0 = arith.constant 0 : i32
    return %arg0, %c0_i32 : i32, i32
  }
}

</mosaic_0001>

<bundles_post_ra>
// kernel: tpu_custom_call.1
= control target key start
LH: loop header
LB: loop body
LE: loop exit
PB: predicated region body
PF: predicated region fallthrough
CT: control target
= control target key end

     0   :  { %7 = vsyncpa [#allocation3], 0  ;;  %s273_s0 = inlined_call_operand.hbm [shape: f32[16,128], index: 0, kind: input, shape index: {}]   ;;  %s274_s1 = inlined_call_operand.hbm [shape: f32[16,128], index: 1, kind: input, shape index: {}]   ;;  %s275_s2 = inlined_call_operand.hbm [shape: f32[8,128], index: 2, kind: output, shape index: {}]  }
   0x1   :  { %8 = vsyncpa [#allocation6], 0 }
   0x2   :  { %9 = vsyncpa [#allocation4], 0  ;;  %s217_s9 = smov [#allocation2]   ;;  %s145_s13 = scalar_lea.hbm %s273_s0, 256 }
   0x3   :  { %s19_s10 = sshll.u32 %s217_s9, 4  ;;  %p146_p0 = scmp.ne.s32.totalorder %s273_s0, %s145_s13  ;;  %s20_s10 = int_to_ptr.vmem [resolvable:$true] %s19_s10 }
   0x4   :  { %p149_p1 = scmp.lt.u32.totalorder %s145_s13, %s273_s0 }
   0x6   :  { %p151_p2 = pnand %p149_p1, %p146_p0 }
   0x8   :  { %154 = shalt.err (!%p151_p2)
}
   0x9   :  { %s155_s18 = scalar_lea.vmem %s20_s10, 256  ;;  %p160_p4 = scmp.lt.s32.totalorder %s20_s10, %s20_s10 }
   0xa   :  { %p156_p3 = scmp.ne.s32.totalorder %s20_s10, %s155_s18  ;;  %p161_p5 = scmp.lt.s32.totalorder %s155_s18, %s155_s18 }
   0xc   :  { %p162_p6 = por %p161_p5, %p160_p4 }
   0xe   :  { %p163_p7 = pnand %p162_p6, %p156_p3 }
  0x10   :  { %166 = shalt.err (!%p163_p7)
}
  0x11   :  { %s218_s19 = smov 128   ;;  %s219_s20 = smov 8  }
  0x12   :  { %25 = dma.hbm_to_vmem [thread:$0]  %s273_s0, 256, %s20_s10, [#allocation3], %s218_s19, %s218_s19, %s219_s20  }
  0x13   :  { %s220_s23 = smov [#allocation5]   ;;  %s167_s27 = scalar_lea.hbm %s274_s1, 256 }
  0x14   :  { %s35_s24 = sshll.u32 %s220_s23, 4  ;;  %p168_p8 = scmp.ne.s32.totalorder %s274_s1, %s167_s27  ;;  %s36_s24 = int_to_ptr.vmem [resolvable:$true] %s35_s24 }
  0x15   :  { %p171_p9 = scmp.lt.u32.totalorder %s167_s27, %s274_s1 }
  0x17   :  { %p173_p10 = pnand %p171_p9, %p168_p8 }
  0x19   :  { %176 = shalt.err (!%p173_p10)
}
  0x1a   :  { %s177_s4 = scalar_lea.vmem %s36_s24, 256  ;;  %p182_p12 = scmp.lt.s32.totalorder %s36_s24, %s36_s24 }
  0x1b   :  { %p178_p11 = scmp.ne.s32.totalorder %s36_s24, %s177_s4  ;;  %p183_p13 = scmp.lt.s32.totalorder %s177_s4, %s177_s4 }
  0x1d   :  { %p184_p0 = por %p183_p13, %p182_p12 }
  0x1f   :  { %p185_p1 = pnand %p184_p0, %p178_p11 }
  0x21   :  { %188 = shalt.err (!%p185_p1)
}
  0x22   :  { %41 = dma.hbm_to_vmem [thread:$0]  %s274_s1, 256, %s36_s24, [#allocation6], %s218_s19, %s218_s19, %s219_s20  }
  0x23   :  { %211 = dma.done.wait [#allocation3], 256  }
  0x24   :  { %212 = vsyncadd [#allocation3], 4294967040 }
  0x25   :  { %213 = dma.done.wait [#allocation6], 256  }
  0x26   :  { %214 = vsyncadd [#allocation6], 4294967040  ;;  %v57_v0 = vld [vmem:[#allocation2] sm:$0xff]  ;;  %v58_v1 = vld [vmem:[#allocation2 + $0x8] sm:$0xff]  ;;  %s221_s1 = smov [#allocation7]  }
  0x27   :  { %v67_v2 = vand.u32 2147483647, %v57_v0  ;;  %v68_v3 = vand.u32 2147483647, %v58_v1  ;;  %v59_v14 = vld [vmem:[#allocation5] sm:$0xff]  ;;  %v60_v15 = vld [vmem:[#allocation5 + $0x8] sm:$0xff] }
  0x28   :  { %v61_v17 = vmax.f32 %v57_v0, 0.0  ;;  %v63_v18 = vmul.f32 %v59_v14, %v57_v0  ;;  %v62_v21 = vmax.f32 %v58_v1, 0.0  ;;  %v64_v22 = vmul.f32 %v60_v15, %v58_v1  ;;  %s117_s6 = sshll.u32 %s221_s1, 4  ;;  %s118_s6 = int_to_ptr.vmem [resolvable:$true] %s117_s6 }
  0x29   :  { %v69_v4 = vsub.f32 0.0, %v67_v2  ;;  %v70_v5 = vsub.f32 0.0, %v68_v3  ;;  %s189_s7 = scalar_lea.vmem %s118_s6, 128  ;;  %p194_p3 = scmp.lt.s32.totalorder %s118_s6, %s118_s6 }
  0x2a   :  { %v65_v26 = vsub.f32 %v61_v17, %v63_v18  ;;  %v66_v29 = vsub.f32 %v62_v21, %v64_v22  ;;  %p190_p2 = scmp.ne.s32.totalorder %s118_s6, %s189_s7  ;;  %p195_p4 = scmp.lt.s32.totalorder %s189_s7, %s189_s7 }
  0x2b   :  { %v71_v6 = vmul.f32 1.442695, %v69_v4  ;;  %v73_v7 = vmul.f32 1.442695, %v70_v5 }
  0x2c   :  { %p196_p5 = por %p195_p4, %p194_p3 }
  0x2d   :  { %133 = vpow2.f32 %v71_v6 }
  0x2e   :  { %135 = vpow2.f32 %v73_v7  ;;  %p197_p6 = pnand %p196_p5, %p190_p2 }
  0x37   :  { %v134_v8 = vpop.eup %133 }
  0x38   :  { %v136_v9 = vpop.eup %135  ;;  %v75_v10 = vadd.f32 1.0, %v134_v8  ;;  %v78_v12 = vmul.f32 -0.5, %v134_v8  ;;  %v81_v19 = vand.u32 2147483647, %v134_v8 }
  0x39   :  { %v84_v11 = vadd.f32 1.0, %v136_v9  ;;  %v87_v13 = vmul.f32 -0.5, %v136_v9  ;;  %v90_v23 = vand.u32 2147483647, %v136_v9 }
  0x3a   :  { %137 = vlog2.f32 %v75_v10  ;;  %v79_v16 = vadd.f32 1.0, %v78_v12  ;;  %vm82_vm0 = vcmp.lt.f32.partialorder %v81_v19, 0.0004427343 }
  0x3b   :  { %139 = vlog2.f32 %v84_v11  ;;  %v88_v20 = vadd.f32 1.0, %v87_v13  ;;  %vm91_vm1 = vcmp.lt.f32.partialorder %v90_v23, 0.0004427343 }
  0x3c   :  { %v80_v24 = vmul.f32 %v134_v8, %v79_v16 }
  0x3d   :  { %v89_v27 = vmul.f32 %v136_v9, %v88_v20 }
  0x44   :  { %v138_v25 = vpop.eup %137 }
  0x45   :  { %v140_v28 = vpop.eup %139  ;;  %v77_v30 = vmul.f32 0.6931472, %v138_v25 }
  0x46   :  { %v86_v31 = vmul.f32 0.6931472, %v140_v28 }
  0x47   :  { %v83_v32 = vsel %vm82_vm0, %v80_v24, %v77_v30 }
  0x48   :  { %v92_v33 = vsel %vm91_vm1, %v89_v27, %v86_v31  ;;  %v93_v34 = vadd.f32 %v83_v32, %v65_v26 }
  0x49   :  { %v94_v35 = vadd.f32 %v92_v33, %v66_v29 }
  0x4a   :  { %v95_v36 = vsub.f32 0.0, %v93_v34 }
  0x4b   :  { %v96_v37 = vsub.f32 0.0, %v94_v35 }
  0x4c   :  { %v97_v38 = vmul.f32 1.442695, %v95_v36 }
  0x4d   :  { %v99_v39 = vmul.f32 1.442695, %v96_v37 }
  0x4e   :  { %141 = vpow2.f32 %v97_v38 }
  0x4f   :  { %143 = vpow2.f32 %v99_v39 }
  0x58   :  { %v142_v40 = vpop.eup %141 }
  0x59   :  { %v144_v41 = vpop.eup %143  ;;  %v101_v42 = vsub.f32 1.0, %v142_v40 }
  0x5a   :  { %v102_v43 = vsub.f32 1.0, %v144_v41 }
  0x5b   :  { %v103_v44 = vmul.f32 %v101_v42, %v101_v42 }
  0x5c   :  { %v104_v45 = vmul.f32 %v102_v43, %v102_v43 }
  0x5d   :  { %v105_v46 = vmul.f32 %v103_v44, %v93_v34 }
  0x5e   :  { %v106_v47 = vmul.f32 %v104_v45, %v94_v35 }
  0x60   :  { %v108_v48 = vadd.f32 %v106_v47, %v105_v46 }
  0x62   :  { %110 = vst [vmem:[#allocation7] sm:$0xff] %v108_v48 }
  0x63   :  { %200 = shalt.err (!%p197_p6)
}
  0x64   :  { %s201_s10 = scalar_lea.hbm %s275_s2, 128 }
  0x65   :  { %p202_p7 = scmp.ne.s32.totalorder %s275_s2, %s201_s10  ;;  %p205_p8 = scmp.lt.u32.totalorder %s201_s10, %s275_s2 }
  0x67   :  { %p207_p9 = pnand %p205_p8, %p202_p7 }
  0x69   :  { %210 = shalt.err (!%p207_p9)
}
  0x6a   :  { %120 = dma.vmem_to_hbm [thread:$0]  %s118_s6, 128, %s275_s2, [#allocation4]  }
  0x6b   :  { %215 = dma.done.wait [#allocation4], 128  }
  0x6c   :  { %216 = vsyncadd [#allocation4], 4294967168 }
  0x6d   :  { %124 = vsyncpa [#allocation3], 1 }
  0x6e   :  { %125 = vsyncpa [#allocation6], 1 }
  0x6f   :  { %126 = vsyncpa [#allocation4], 1 }

</bundles_post_ra>
